<compile_context>
chip_gen: v7x
topology: tpu7x:2x2x1
jax: 0.10.0
libtpu: 0.0.40
codegen_flags: <defaults>
</compile_context>

<pallas_src>
import jax
import jax.numpy as jnp
from jax.experimental import pallas as pl
from jax.experimental.pallas import tpu as pltpu


def _round_up(x, m):
    return ((x + m - 1) // m) * m


def _prefix_encoder_kernel(idx_ref, emb_ref, w1_ref, b1_ref, w2_ref, b2_ref,
                           o_ref, h_ref):
    # idx_ref: (tm, 1) int32   emb_ref: (P, H) bf16   w1_ref: (H, PH) bf16
    # b1_ref : (1, PH) f32     w2_ref: (PH, tn) bf16  b2_ref: (1, tn) f32
    # o_ref  : (tm, tn) f32    h_ref (scratch): (tm, PH) bf16

    @pl.when(pl.program_id(1) == 0)
    def _():
        tm = idx_ref.shape[0]
        P = emb_ref.shape[0]
        # Fused embedding gather as a one-hot matmul on the MXU.
        iota = jax.lax.broadcasted_iota(jnp.int32, (tm, P), 1)
        onehot = jnp.where(iota == idx_ref[...], 1.0, 0.0).astype(emb_ref.dtype)
        tok = jnp.dot(onehot, emb_ref[...],
                      preferred_element_type=jnp.float32)          # (tm, H) f32
        # First linear (bf16 operands, f32 accumulate).
        h = jnp.dot(tok.astype(w1_ref.dtype), w1_ref[...],
                    preferred_element_type=jnp.float32)            # (tm, PH) f32
        # Bias + tanh in f32 (EUP tanh; keeps v5e elementwise path f32).
        h = jnp.tanh(h + b1_ref[...])
        # Cache hidden activation for all OUT tiles of this row tile.
        h_ref[...] = h.astype(h_ref.dtype)

    # Second linear on the current OUT tile (bf16 operands, f32 accumulate).
    y = jnp.dot(h_ref[...], w2_ref[...],
                preferred_element_type=jnp.float32)                # (tm, tn) f32
    o_ref[...] = (y + b2_ref[...]).astype(o_ref.dtype)


def prefix_mlp_fused(idx_flat, emb, w1, b1, w2, b2):
    """idx_flat: (M,) int32 token ids.
    Returns (M, OUT) f32 == tanh(emb[idx] @ w1 + b1) @ w2 + b2,
    fused (gather + MLP) in a single pallas_call."""
    (M,) = idx_flat.shape
    P, H = emb.shape
    PH = w1.shape[1]
    OUT = w2.shape[1]

    # ----- row tiling: one fat tile when small, 128-row tiles when large -----
    if M <= 512:
        tm = _round_up(max(M, 1), 8)
    else:
        tm = 128
    M_pad = _round_up(M, tm)

    # ----- OUT tiling: bound VMEM for W2 / output tiles (needed on v7x) -----
    if OUT <= 2048:
        tn = OUT
        OUT_pad = OUT
    else:
        # Lane-dense tiles: pad OUT to a multiple of 128, pick the largest
        # tile <= 2048 that divides the padded width.
        OUT_pad = _round_up(OUT, 128)
        tn = next(d for d in range(2048, 127, -128) if OUT_pad % d == 0)

    grid = (M_pad // tm, OUT_pad // tn)

    # Pad token ids to M_pad rows (padded rows gather row 0; sliced off below).
    idx = jnp.zeros((M_pad, 1), jnp.int32).at[:M, 0].set(
        idx_flat.astype(jnp.int32))

    # bf16 matmul operands; biases stay f32.
    emb_bf = emb.astype(jnp.bfloat16)
    w1_bf = w1.astype(jnp.bfloat16)
    w2_bf = w2.astype(jnp.bfloat16)
    b1_f = b1.reshape(1, PH).astype(jnp.float32)
    b2_f = b2.reshape(1, OUT).astype(jnp.float32)
    if OUT_pad != OUT:
        w2_bf = jnp.pad(w2_bf, ((0, 0), (0, OUT_pad - OUT)))
        b2_f = jnp.pad(b2_f, ((0, 0), (0, OUT_pad - OUT)))

    cost = pl.CostEstimate(
        flops=2 * M_pad * (P * H + H * PH) + 2 * M_pad * PH * OUT_pad,
        transcendentals=M_pad * PH,
        bytes_accessed=(M_pad * 4 + P * H * 2 + H * PH * 2 + PH * 4
                        + PH * OUT_pad * 2 + OUT_pad * 4 + M_pad * OUT_pad * 4),
    )

    # VMEM budget: resident emb/W1/b1 + double-buffered W2/b2/out/idx tiles
    # + the h scratch; ask for 2x headroom, capped well below physical VMEM
    # on all generations (v7x: 64 MiB).
    vmem_need = (P * H * 2 + H * PH * 2 + PH * 4
                 + 2 * (PH * tn * 2 + tn * 4)
                 + 2 * (tm * tn * 4)
                 + 2 * (tm * 4)
                 + tm * PH * 2)
    vmem_limit = int(min(48 * 1024 * 1024,
                         max(2 * vmem_need, 8 * 1024 * 1024)))

    out = pl.pallas_call(
        _prefix_encoder_kernel,
        out_shape=jax.ShapeDtypeStruct((M_pad, OUT_pad), jnp.float32),
        grid_spec=pltpu.PrefetchScalarGridSpec(
            num_scalar_prefetch=0,
            grid=grid,
            in_specs=[
                pl.BlockSpec((tm, 1), lambda i, j: (i, 0)),    # token ids
                pl.BlockSpec((P, H), lambda i, j: (0, 0)),     # embedding (resident)
                pl.BlockSpec((H, PH), lambda i, j: (0, 0)),    # W1 (resident)
                pl.BlockSpec((1, PH), lambda i, j: (0, 0)),    # b1
                pl.BlockSpec((PH, tn), lambda i, j: (0, j)),   # W2 tile over OUT
                pl.BlockSpec((1, tn), lambda i, j: (0, j)),    # b2 tile
            ],
            out_specs=pl.BlockSpec((tm, tn), lambda i, j: (i, j)),
            scratch_shapes=[pltpu.VMEM((tm, PH), jnp.bfloat16)],  # cached h
        ),
        compiler_params=pltpu.CompilerParams(
            dimension_semantics=("parallel", "arbitrary"),
            vmem_limit_bytes=vmem_limit),
        cost_estimate=cost,
    )(idx, emb_bf, w1_bf, b1_f, w2_bf, b2_f)

    return out[:M, :OUT]


class PrefixEncoderPallas:
    """JAX/Pallas port of PromptCAR.PrefixEncoder."""

    def __init__(self, key, pre_seq_len=8, hidden_size=32,
                 prefix_hidden_size=32, num_hidden_layers=2,
                 prefix_projection=True):
        self.prefix_projection = prefix_projection
        self.pre_seq_len = pre_seq_len
        self.hidden_size = hidden_size
        self.prefix_hidden_size = prefix_hidden_size
        self.num_hidden_layers = num_hidden_layers
        out_dim = num_hidden_layers * 2 * hidden_size

        k = jax.random.split(key, 6)
        if prefix_projection:
            # nn.Embedding(pre_seq_len, hidden_size)
            self.embedding = jax.random.normal(
                k[0], (pre_seq_len, hidden_size), jnp.float32)
            # Linear(H -> PH), stored (in, out) so the kernel does x @ W + b
            self.w1 = jax.random.normal(
                k[1], (hidden_size, prefix_hidden_size), jnp.float32) * 0.05
            self.b1 = jax.random.normal(
                k[2], (1, prefix_hidden_size), jnp.float32) * 0.01
            # Linear(PH -> L*2*H)
            self.w2 = jax.random.normal(
                k[3], (prefix_hidden_size, out_dim), jnp.float32) * 0.05
            self.b2 = jax.random.normal(
                k[4], (1, out_dim), jnp.float32) * 0.01
        else:
            self.embedding = jax.random.normal(
                k[0], (pre_seq_len, out_dim), jnp.float32)

    def __call__(self, prefix):
        # prefix: (B, S) int32 indices into the embedding table.
        B, S = prefix.shape
        if not self.prefix_projection:
            # Pure embedding lookup, no hot-path compute -> plain JAX glue.
            return jnp.take(self.embedding, prefix, axis=0)

        idx_flat = prefix.reshape(B * S)
        out = prefix_mlp_fused(idx_flat, self.embedding,
                               self.w1, self.b1, self.w2, self.b2)
        return out.reshape(B, S, self.num_hidden_layers * 2 * self.hidden_size)


def _reference(enc, prefix):
    tok = jnp.take(enc.embedding, prefix, axis=0)
    h = jnp.tanh(tok @ enc.w1 + enc.b1[0])
    return h @ enc.w2 + enc.b2[0]


if __name__ == "__main__":
    key = jax.random.PRNGKey(0)
    k_param, k_idx, k_idx2 = jax.random.split(key, 3)

    B, S = 2, 8            # batch, pre_seq_len
    H, PH, L = 32, 32, 2   # hidden, prefix_hidden, num_hidden_layers

    enc = PrefixEncoderPallas(k_param, pre_seq_len=S, hidden_size=H,
                              prefix_hidden_size=PH, num_hidden_layers=L,
                              prefix_projection=True)

    prefix = jax.random.randint(k_idx, (B, S), 0, S, dtype=jnp.int32)
    out = jax.block_until_ready(enc(prefix))
    ref = _reference(enc, prefix)
    assert out.shape == (B, S, L * 2 * H), out.shape
    # bf16 MXU operands with f32 accumulation -> loosened tolerance vs f32 ref.
    assert jnp.allclose(out, ref, atol=2e-2, rtol=2e-2), \
        float(jnp.max(jnp.abs(out - ref)))

    # Ragged case: B*S not a multiple of 8 exercises the row-padding path.
    prefix2 = jax.random.randint(k_idx2, (3, 5), 0, S, dtype=jnp.int32)
    out2 = jax.block_until_ready(enc(prefix2))
    ref2 = _reference(enc, prefix2)
    assert out2.shape == (3, 5, L * 2 * H), out2.shape
    assert jnp.allclose(out2, ref2, atol=2e-2, rtol=2e-2), \
        float(jnp.max(jnp.abs(out2 - ref2)))

    print("KERNEL_OK")
</pallas_src>

<mosaic_0001>
module attributes {stable_mosaic.version = 11 : i64} {
  func.func @_prefix_encoder_kernel(%arg0: i32, %arg1: i32, %arg2: memref<16x1xi32, #tpu.memory_space<vmem>>, %arg3: memref<8x32xbf16, #tpu.memory_space<vmem>>, %arg4: memref<32x32xbf16, #tpu.memory_space<vmem>>, %arg5: memref<1x32xf32, #tpu.memory_space<vmem>>, %arg6: memref<32x128xbf16, #tpu.memory_space<vmem>>, %arg7: memref<1x128xf32, #tpu.memory_space<vmem>>, %arg8: memref<16x128xf32, #tpu.memory_space<vmem>>, %arg9: memref<16x32xbf16, #tpu.memory_space<vmem>>) attributes {dimension_semantics = [#tpu.dimension_semantics<parallel>, #tpu.dimension_semantics<arbitrary>], iteration_bounds = array<i64: 1, 1>, scalar_prefetch = 0 : i64, scratch_operands = 1 : i64, tpu.core_type = #tpu.core_type<tc>, window_params = [{transform_indices = @transform_0, window_bounds = array<i64: 16, 1>}, {pipeline_mode = #tpu.pipeline_mode<synchronous>, transform_indices = @transform_1, window_bounds = array<i64: 8, 32>}, {pipeline_mode = #tpu.pipeline_mode<synchronous>, transform_indices = @transform_2, window_bounds = array<i64: 32, 32>}, {pipeline_mode = #tpu.pipeline_mode<synchronous>, transform_indices = @transform_3, window_bounds = array<i64: 1, 32>}, {transform_indices = @transform_4, window_bounds = array<i64: 32, 128>}, {transform_indices = @transform_5, window_bounds = array<i64: 1, 128>}, {transform_indices = @transform_6, window_bounds = array<i64: 16, 128>}]} {
    %c0_i32 = arith.constant 0 : i32
    %0 = arith.cmpi eq, %arg1, %c0_i32 : i32
    %1 = arith.extui %0 : i1 to i32
    %c0_i32_0 = arith.constant 0 : i32
    %2 = arith.cmpi ne, %1, %c0_i32_0 : i32
    scf.if %2 {
      %10 = tpu.iota {dimensions = array<i32: 1>} : vector<16x8xi32>
      %c0_8 = arith.constant 0 : index
      %c0_9 = arith.constant 0 : index
      %11 = vector.load %arg2[%c0_8, %c0_9] : memref<16x1xi32, #tpu.memory_space<vmem>>, vector<16x1xi32>
      %12 = vector.broadcast %11 : vector<16x1xi32> to vector<16x8xi32>
      %13 = arith.cmpi eq, %10, %12 : vector<16x8xi32>
      %cst_10 = arith.constant 1.000000e+00 : f32
      %cst_11 = arith.constant 0.000000e+00 : f32
      %14 = vector.broadcast %cst_10 : f32 to vector<16x8xf32>
      %15 = vector.broadcast %cst_11 : f32 to vector<16x8xf32>
      %16 = arith.select %13, %14, %15 : vector<16x8xi1>, vector<16x8xf32>
      %17 = arith.truncf %16 : vector<16x8xf32> to vector<16x8xbf16>
      %c0_12 = arith.constant 0 : index
      %c0_13 = arith.constant 0 : index
      %18 = vector.load %arg3[%c0_12, %c0_13] : memref<8x32xbf16, #tpu.memory_space<vmem>>, vector<8x32xbf16>
      %cst_14 = arith.constant dense<0.000000e+00> : vector<16x32xf32>
      %19 = tpu.matmul %17, %18, %cst_14 {dimension_numbers = #tpu.dot_dimension_numbers<[1], [0], [0], [1], [0, 0, 1, 1], [], []>} : vector<16x8xbf16>, vector<8x32xbf16>, vector<16x32xf32> -> vector<16x32xf32>
      %20 = arith.truncf %19 : vector<16x32xf32> to vector<16x32xbf16>
      %c0_15 = arith.constant 0 : index
      %c0_16 = arith.constant 0 : index
      %21 = vector.load %arg4[%c0_15, %c0_16] : memref<32x32xbf16, #tpu.memory_space<vmem>>, vector<32x32xbf16>
      %cst_17 = arith.constant dense<0.000000e+00> : vector<16x32xf32>
      %22 = tpu.matmul %20, %21, %cst_17 {dimension_numbers = #tpu.dot_dimension_numbers<[1], [0], [0], [1], [0, 0, 1, 1], [], []>} : vector<16x32xbf16>, vector<32x32xbf16>, vector<16x32xf32> -> vector<16x32xf32>
      %c0_18 = arith.constant 0 : index
      %c0_19 = arith.constant 0 : index
      %23 = vector.load %arg5[%c0_18, %c0_19] : memref<1x32xf32, #tpu.memory_space<vmem>>, vector<1x32xf32>
      %24 = vector.broadcast %23 : vector<1x32xf32> to vector<16x32xf32>
      %25 = arith.addf %22, %24 : vector<16x32xf32>
      %26 = math.tanh %25 : vector<16x32xf32>
      %27 = arith.truncf %26 : vector<16x32xf32> to vector<16x32xbf16>
      %c0_20 = arith.constant 0 : index
      %c0_21 = arith.constant 0 : index
      %28 = vector.load %arg9[%c0_20, %c0_21] : memref<16x32xbf16, #tpu.memory_space<vmem>>, vector<16x32xbf16>
      tpu.vector_store %arg9[%c0_20, %c0_21], %27 {strides = array<i32>} : memref<16x32xbf16, #tpu.memory_space<vmem>>, vector<16x32xbf16>,
    } else {
    }
    %c0 = arith.constant 0 : index
    %c0_1 = arith.constant 0 : index
    %3 = vector.load %arg9[%c0, %c0_1] : memref<16x32xbf16, #tpu.memory_space<vmem>>, vector<16x32xbf16>
    %c0_2 = arith.constant 0 : index
    %c0_3 = arith.constant 0 : index
    %4 = vector.load %arg6[%c0_2, %c0_3] : memref<32x128xbf16, #tpu.memory_space<vmem>>, vector<32x128xbf16>
    %cst = arith.constant dense<0.000000e+00> : vector<16x128xf32>
    %5 = tpu.matmul %3, %4, %cst {dimension_numbers = #tpu.dot_dimension_numbers<[1], [0], [0], [1], [0, 0, 1, 1], [], []>} : vector<16x32xbf16>, vector<32x128xbf16>, vector<16x128xf32> -> vector<16x128xf32>
    %c0_4 = arith.constant 0 : index
    %c0_5 = arith.constant 0 : index
    %6 = vector.load %arg7[%c0_4, %c0_5] : memref<1x128xf32, #tpu.memory_space<vmem>>, vector<1x128xf32>
    %7 = vector.broadcast %6 : vector<1x128xf32> to vector<16x128xf32>
    %8 = arith.addf %5, %7 : vector<16x128xf32>
    %c0_6 = arith.constant 0 : index
    %c0_7 = arith.constant 0 : index
    %9 = vector.load %arg8[%c0_6, %c0_7] : memref<16x128xf32, #tpu.memory_space<vmem>>, vector<16x128xf32>
    tpu.vector_store %arg8[%c0_6, %c0_7], %8 {strides = array<i32>} : memref<16x128xf32, #tpu.memory_space<vmem>>, vector<16x128xf32>,
    return
  }
  func.func @transform_0(%arg0: i32, %arg1: i32) -> (i32, i32) {
    %c0_i32 = arith.constant 0 : i32
    %c0_i32_0 = arith.constant 0 : i32
    return %arg0, %c0_i32 : i32, i32
  }
  func.func @transform_1(%arg0: i32, %arg1: i32) -> (i32, i32) {
    %c0_i32 = arith.constant 0 : i32
    %c0_i32_0 = arith.constant 0 : i32
    %c0_i32_1 = arith.constant 0 : i32
    return %c0_i32, %c0_i32_0 : i32, i32
  }
  func.func @transform_2(%arg0: i32, %arg1: i32) -> (i32, i32) {
    %c0_i32 = arith.constant 0 : i32
    %c0_i32_0 = arith.constant 0 : i32
    %c0_i32_1 = arith.constant 0 : i32
    return %c0_i32, %c0_i32_0 : i32, i32
  }
  func.func @transform_3(%arg0: i32, %arg1: i32) -> (i32, i32) {
    %c0_i32 = arith.constant 0 : i32
    %c0_i32_0 = arith.constant 0 : i32
    %c0_i32_1 = arith.constant 0 : i32
    return %c0_i32, %c0_i32_0 : i32, i32
  }
  func.func @transform_4(%arg0: i32, %arg1: i32) -> (i32, i32) {
    %c0_i32 = arith.constant 0 : i32
    %c0_i32_0 = arith.constant 0 : i32
    return %c0_i32, %arg1 : i32, i32
  }
  func.func @transform_5(%arg0: i32, %arg1: i32) -> (i32, i32) {
    %c0_i32 = arith.constant 0 : i32
    %c0_i32_0 = arith.constant 0 : i32
    return %c0_i32, %arg1 : i32, i32
  }
  func.func @transform_6(%arg0: i32, %arg1: i32) -> (i32, i32) {
    %c0_i32 = arith.constant 0 : i32
    return %arg0, %arg1 : i32, i32
  }
}

</mosaic_0001>

<bundles_post_ra>
// kernel: tpu_custom_call.1
= control target key start
LH: loop header
LB: loop body
LE: loop exit
PB: predicated region body
PF: predicated region fallthrough
CT: control target
= control target key end

     0   :  { %11 = vsyncpa [#allocation4], 0  ;;  %s514_s0 = inlined_call_operand.vmem [shape: s32[16,1], index: 0, kind: input, shape index: {}]   ;;  %s515_s1 = inlined_call_operand.hbm [shape: bf16[8,32], index: 1, kind: input, shape index: {}]   ;;  %s516_s2 = inlined_call_operand.vmem [shape: bf16[32,32], index: 2, kind: input, shape index: {}]   ;;  %s517_s3 = inlined_call_operand.hbm [shape: f32[1,32], index: 3, kind: input, shape index: {}]   ;;  %s518_s4 = inlined_call_operand.vmem [shape: bf16[32,128], index: 4, kind: input, shape index: {}]   ;;  %s519_s5 = inlined_call_operand.vmem [shape: f32[1,128], index: 5, kind: input, shape index: {}]   ;;  %s520_s6 = inlined_call_operand.hbm [shape: f32[16,128], index: 6, kind: output, shape index: {}]  }
   0x1   :  { %12 = vsyncpa [#allocation7], 0 }
   0x2   :  { %13 = vsyncpa [#allocation5], 0  ;;  %s408_s21 = smov [#allocation3]   ;;  %s409_s23 = smov [#allocation6]  }
   0x3   :  { %s22_s22 = sshll.u32 %s408_s21, 4  ;;  %s34_s24 = sshll.u32 %s409_s23, 4  ;;  %s23_s22 = int_to_ptr.vmem [resolvable:$true] %s22_s22  ;;  %s35_s24 = int_to_ptr.vmem [resolvable:$true] %s34_s24 }
   0x4   :  { %s336_s27 = scalar_lea.hbm %s515_s1, 64 }
   0x5   :  { %p337_p0 = scmp.ne.s32.totalorder %s515_s1, %s336_s27  ;;  %p340_p1 = scmp.lt.u32.totalorder %s336_s27, %s515_s1 }
   0x7   :  { %p342_p2 = pnand %p340_p1, %p337_p0 }
   0x9   :  { %345 = shalt.err (!%p342_p2)
}
   0xa   :  { %s346_s8 = scalar_lea.vmem %s23_s22, 64  ;;  %p351_p4 = scmp.lt.s32.totalorder %s23_s22, %s23_s22 }
   0xb   :  { %p347_p3 = scmp.ne.s32.totalorder %s23_s22, %s346_s8  ;;  %p352_p5 = scmp.lt.s32.totalorder %s346_s8, %s346_s8 }
   0xd   :  { %p353_p6 = por %p352_p5, %p351_p4 }
   0xf   :  { %p354_p7 = pnand %p353_p6, %p347_p3 }
  0x11   :  { %357 = shalt.err (!%p354_p7)
}
  0x12   :  { %25 = dma.hbm_to_vmem [thread:$0]  %s515_s1, 64, %s23_s22, [#allocation4]  }
  0x13   :  { %s358_s13 = scalar_lea.hbm %s517_s3, 16 }
  0x14   :  { %p359_p8 = scmp.ne.s32.totalorder %s517_s3, %s358_s13  ;;  %p362_p9 = scmp.lt.u32.totalorder %s358_s13, %s517_s3 }
  0x16   :  { %p364_p10 = pnand %p362_p9, %p359_p8 }
  0x18   :  { %367 = shalt.err (!%p364_p10)
}
  0x19   :  { %s368_s18 = scalar_lea.vmem %s35_s24, 16  ;;  %s372_s19 = scalar_lea.vmem %s35_s24, 32 }
  0x1a   :  { %p369_p11 = scmp.ne.s32.totalorder %s35_s24, %s368_s18  ;;  %p373_p12 = scmp.lt.s32.totalorder %s35_s24, %s35_s24 }
  0x1b   :  { %p374_p13 = scmp.lt.s32.totalorder %s372_s19, %s368_s18 }
  0x1d   :  { %p375_p0 = por %p374_p13, %p373_p12 }
  0x1f   :  { %p376_p1 = pnand %p375_p0, %p369_p11 }
  0x21   :  { %379 = shalt.err (!%p376_p1)
}
  0x22   :  { %37 = dma.hbm_to_vmem [thread:$0]  %s517_s3, 16, %s35_s24, [#allocation7]  }
  0x23   :  { %402 = dma.done.wait [#allocation4], 64  }
  0x24   :  { %403 = vsyncadd [#allocation4], 4294967232 }
  0x25   :  { %404 = dma.done.wait [#allocation7], 16  }
  0x26   :  { %405 = vsyncadd [#allocation7], 4294967280  ;;  %v410_v0 = vmov 0   ;;  %v411_v1 = vmov 0.0   ;;  %v55_v2 = vld [vmem:[%s514_s0] sm:$0xff]  ;;  %v56_v3 = vld [vmem:[%s514_s0 + $0x8] sm:$0xff]  ;;  %v53_v7 = vlaneseq }
  0x27   :  { %327 = vset.pattern.permute.xlu0 %v410_v0  ;;  %297 = vmatprep.subr.bf16.mxu0 %v411_v1  ;;  %v68_v4 = vld [vmem:[#allocation3] sm:$0xf]  ;;  %vm73_vm0 = vcmask 1043456   ;;  %vm412_vm1 = vmmov 0   ;;  %v328_v6 = vld [vmem:[%s516_s2] sm:$0xff]   ;;  %vm69_vm4 = vcmask 64512  }
  0x28   :  { %303 = vmatprep.subr.bf16.mxu1 %v411_v1  ;;  %58 = vperm.xlu0 %327, %v55_v2   ;;  %v75_v5 = vsel %vm73_vm0, %v68_v4, 0  ;;  %v54_v8 = vand.u32 127, %v53_v7  ;;  %v329_v14 = vld [vmem:[%s516_s2 + $0x8] sm:$0xff]   ;;  %vm142_vm5 = vcmask 261120   ;;  %v330_v20 = vld [vmem:[%s518_s4] sm:$0xff]   ;;  %s413_s7 = smov [#allocation8]  }
  0x29   :  { %298 = vmatpush3.bf16.msra.mxu0 %v75_v5  ;;  %299 = vmatprep.mubr.msk.bf16.mxu0 %vm412_vm1, %v411_v1  ;;  %v331_v21 = vld [vmem:[%s518_s4 + $0x8] sm:$0xff]   ;;  %v281_v22 = vld [vmem:[#allocation6] ss:$0 sm:$0xff]  ;;  %v285_v33 = vld [vmem:[%s519_s5] ss:$0 sm:$0xff]  ;;  %s267_s8 = sshll.u32 %s413_s7, 4  ;;  %s268_s8 = int_to_ptr.vmem [resolvable:$true] %s267_s8 }
  0x2a   :  { %311 = vmatprep.subr.bf16.mxu0 %v411_v1  ;;  %307 = vmatprep.mubr.msk.bf16.mxu1 %vm412_vm1, %v411_v1  ;;  %s380_s9 = scalar_lea.vmem %s268_s8, 256  ;;  %p385_p3 = scmp.lt.s32.totalorder %s268_s8, %s268_s8 }
  0x2b   :  { %304 = vmatpush3.bf16.msra.mxu1 %v328_v6  ;;  %p381_p2 = scmp.ne.s32.totalorder %s268_s8, %s380_s9  ;;  %p386_p4 = scmp.lt.s32.totalorder %s380_s9, %s380_s9 }
  0x2c   :  { %61 = vperm.xlu0 %327, %v56_v3   ;;  %305 = vmatprep.subr.bf16.mxu1 %v411_v1 }
  0x2d   :  { %p387_p5 = por %p386_p4, %p385_p3 }
  0x2f   :  { %306 = vmatpush3.bf16.msra.mxu1 %v329_v14  ;;  %p388_p6 = pnand %p387_p5, %p381_p2 }
  0xa7   :  { %v59_v9 = vpop.permute.xlu0 %58 }
  0xa8   :  { %vm63_vm2 = vcmp.eq.s32.totalorder %v54_v8, %v59_v9 }
  0xa9   :  { %v65_v11 = vsel %vm63_vm2, 1.0, %v411_v1 }
  0xab   :  { %v62_v10 = vpop.permute.xlu0 %61 }
  0xac   :  { %vm64_vm3 = vcmp.eq.s32.totalorder %v54_v8, %v62_v10 }
  0xad   :  { %v66_v12 = vsel %vm64_vm3, 1.0, %v411_v1 }
  0xae   :  { %v67_v13 = vpack.c.bf16 %v66_v12, %v65_v11 }
  0xb0   :  { %300 = vmatmul.mubr.msk.bf16.vlgmr.msra.gmra.mrb[0].mxu0 %vm69_vm4, %v67_v13 }
  0xb1   :  { %315 = vmatprep.mubr.msk.bf16.mxu0 %vm412_vm1, %v411_v1  ;;  %312 = vmatpush3.bf16.msra.mxu0 %v330_v20 }
  0xb2   :  { %313 = vmatprep.subr.bf16.mxu0 %v411_v1 }
  0xb5   :  { %314 = vmatpush3.bf16.msra.mxu0 %v331_v21 }
 0x183   :  { %v111_v15 = vpop.f32.mrb[0].mxu0 }
 0x184   :  { %v301_v16 = vpop.f32.mrb[1].mxu0 }
 0x185   :  { %v114_v17 = vpop.f32.mrb[2].mxu0 }
 0x186   :  { %v118_v18 = vpack.c.bf16 %v114_v17, %v111_v15  ;;  %v302_v19 = vpop.f32.mrb[3].mxu0 }
 0x188   :  { %308 = vmatmul.mubr.msk.bf16.vlgmr.msra.gmra.mrb[0].mxu1 %vm142_vm5, %v118_v18 }
 0x25b   :  { %v180_v23 = vpop.f32.mrb[0].mxu1 }
 0x25c   :  { %v181_v24 = vadd.f32 %v281_v22, %v180_v23  ;;  %v309_v25 = vpop.f32.mrb[1].mxu1 }
 0x25d   :  { %v183_v26 = vpop.f32.mrb[2].mxu1 }
 0x25e   :  { %v184_v27 = vadd.f32 %v281_v22, %v183_v26  ;;  %v310_v28 = vpop.f32.mrb[3].mxu1  ;;  %332 = vtanh.f32 %v181_v24 }
 0x260   :  { %334 = vtanh.f32 %v184_v27 }
 0x268   :  { %v333_v29 = vpop.eup %332 }
 0x26a   :  { %v335_v30 = vpop.eup %334 }
 0x26b   :  { %v189_v31 = vpack.c.bf16 %v335_v30, %v333_v29 }
 0x26d   :  { %190 = vst.msk [vmem:[#allocation2] sm:$0xff] %vm142_vm5, %v189_v31 }
 0x274   :  { %v191_v32 = vld [vmem:[#allocation2] sm:$0xff] }
 0x275   :  { %316 = vmatmul.mubr.msk.bf16.vlgmr.msra.gmra.mrb[4].mxu0 %vm142_vm5, %v191_v32 }
 0x348   :  { %v253_v34 = vpop.f32.mrb[4].mxu0 }
 0x349   :  { %v254_v35 = vadd.f32 %v285_v33, %v253_v34  ;;  %v317_v36 = vpop.f32.mrb[5].mxu0 }
 0x34a   :  { %v256_v37 = vpop.f32.mrb[6].mxu0 }
 0x34b   :  { %260 = vst [vmem:[#allocation8] sm:$0xff] %v254_v35  ;;  %v257_v38 = vadd.f32 %v285_v33, %v256_v37  ;;  %v318_v39 = vpop.f32.mrb[7].mxu0 }
 0x34d   :  { %261 = vst [vmem:[#allocation8 + $0x8] sm:$0xff] %v257_v38 }
 0x34e   :  { %391 = shalt.err (!%p388_p6)
}
 0x34f   :  { %s392_s11 = scalar_lea.hbm %s520_s6, 256 }
 0x350   :  { %p393_p7 = scmp.ne.s32.totalorder %s520_s6, %s392_s11  ;;  %p396_p8 = scmp.lt.u32.totalorder %s392_s11, %s520_s6 }
 0x352   :  { %p398_p9 = pnand %p396_p8, %p393_p7 }
 0x354   :  { %401 = shalt.err (!%p398_p9)
}
 0x355   :  { %s414_s16 = smov 128   ;;  %s415_s17 = smov 8  }
 0x356   :  { %273 = dma.vmem_to_hbm [thread:$0]  %s268_s8, 256, %s520_s6, [#allocation5], %s414_s16, %s414_s16, %s415_s17  }
 0x357   :  { %406 = dma.done.wait [#allocation5], 256  }
 0x358   :  { %407 = vsyncadd [#allocation5], 4294967040 }
 0x359   :  { %277 = vsyncpa [#allocation4], 1 }
 0x35a   :  { %278 = vsyncpa [#allocation7], 1 }
 0x35b   :  { %279 = vsyncpa [#allocation5], 1 }

</bundles_post_ra>
